<compile_context>
chip_gen: v7x
topology: tpu7x:2x2x1
jax: 0.10.0
libtpu: 0.0.40
codegen_flags: <defaults>
</compile_context>

<pallas_src>
import functools

import jax
import jax.numpy as jnp
from jax import lax
from jax.experimental import pallas as pl
from jax.experimental.pallas import tpu as pltpu


def _softplus(x):
    # log(1 + exp(x)) computed stably (no overflow / -inf).
    return jnp.maximum(x, 0.0) + jnp.log(1.0 + jnp.exp(-jnp.abs(x)))


def _round_up(x, n):
    return ((x + n - 1) // n) * n


def _w2v_kernel(
    ids_mat_ref,      # (tb, m) int32 : per-column ids into table_mat
    ids_vec_ref,      # (tb, 2) int32 : col 0 = pos vec id, col 1 = neg vec id
    table_vec_ref,    # (voc, E)      : rows gathered per example (one-hot MXU gather)
    table_mat_t_ref,  # (E, voc)      : transposed table for the scores matmul
    loss_ref,         # (1, 1) f32 output
    acc_pos_ref,      # (tb, 1) f32 scratch (running positive-term sums)
    acc_neg_ref,      # (tb, 1) f32 scratch (running negative-term sums)
    *,
    tb, m, voc, split, share_vec, b_total, pos_count, neg_count,
):
    step = pl.program_id(0)
    num_steps = pl.num_programs(0)

    @pl.when(step == 0)
    def _init():
        acc_pos_ref[...] = jnp.zeros_like(acc_pos_ref)
        acc_neg_ref[...] = jnp.zeros_like(acc_neg_ref)

    ids_m = ids_mat_ref[...]                               # (tb, m)
    ids_v = ids_vec_ref[...]                               # (tb, 2)
    tvec = table_vec_ref[...].astype(jnp.float32)          # (voc, E)
    tmat_t = table_mat_t_ref[...].astype(jnp.float32)      # (E, voc)

    voc_iota = lax.broadcasted_iota(jnp.int32, (tb, voc), 1)

    # Gather the per-example "vector" row with a one-hot matmul (MXU), then one
    # scores matmul gives its dot against every row of table_mat.
    oh_pos = (ids_v[:, 0:1] == voc_iota).astype(jnp.float32)              # (tb, voc)
    vec_pos = jnp.dot(oh_pos, tvec, preferred_element_type=jnp.float32)   # (tb, E)
    scores_pos = jnp.dot(vec_pos, tmat_t,
                         preferred_element_type=jnp.float32)              # (tb, voc)

    if share_vec:
        # skipgram: context (positive) and rand (negative) columns both dot
        # against the same center embedding -> one scores matrix serves both.
        scores_neg = scores_pos
    else:
        # cbow: separate center-weight (positive) and rand-weight (negative) rows.
        oh_neg = (ids_v[:, 1:2] == voc_iota).astype(jnp.float32)
        vec_neg = jnp.dot(oh_neg, tvec, preferred_element_type=jnp.float32)
        scores_neg = jnp.dot(vec_neg, tmat_t, preferred_element_type=jnp.float32)

    # Per-column one-hot select (VPU) + stable log-sigmoid terms.  m is small
    # and static, so this Python loop is fully unrolled.
    pos_sum = jnp.zeros((tb, 1), jnp.float32)
    neg_sum = jnp.zeros((tb, 1), jnp.float32)
    for j in range(m):
        sel = ids_m[:, j:j + 1] == voc_iota                               # (tb, voc)
        if share_vec:
            x = jnp.sum(jnp.where(sel, scores_pos, 0.0), axis=-1, keepdims=True)
            if j < split:
                pos_sum = pos_sum + _softplus(-x)
            else:
                neg_sum = neg_sum - jnp.log(jax.nn.sigmoid(-x) + 1e-3)
        else:
            xp = jnp.sum(jnp.where(sel, scores_pos, 0.0), axis=-1, keepdims=True)
            xn = jnp.sum(jnp.where(sel, scores_neg, 0.0), axis=-1, keepdims=True)
            pos_sum = pos_sum + _softplus(-xp)
            neg_sum = neg_sum - jnp.log(jax.nn.sigmoid(-xn) + 1e-3)

    # Mask padded batch rows, accumulate element-wise (no per-step reduction).
    row_valid = (step * tb + lax.broadcasted_iota(jnp.int32, (tb, 1), 0)) < b_total
    acc_pos_ref[...] += jnp.where(row_valid, pos_sum, 0.0)
    acc_neg_ref[...] += jnp.where(row_valid, neg_sum, 0.0)

    @pl.when(step == num_steps - 1)
    def _finalize():
        loss_ref[...] = (
            jnp.sum(acc_pos_ref[...], keepdims=True) * (1.0 / pos_count)
            + jnp.sum(acc_neg_ref[...], keepdims=True) * (1.0 / neg_count))


def word2vec_forward(arch, emb_table, lin_weight, center, context, rand, *,
                     batch_tile=128):
    """Mirrors Word2Vec.forward(center, context, rand) for 'skipgram' / 'cbow'."""
    voc, emb_dim = emb_table.shape
    b_total = int(center.shape[0])

    center = jnp.asarray(center, jnp.int32).reshape(b_total)
    context = jnp.asarray(context, jnp.int32)
    rand = jnp.asarray(rand, jnp.int32)

    if arch == "skipgram":
        c, k = int(context.shape[1]), int(rand.shape[1])
        mat_ids = jnp.concatenate([context, rand], axis=1)            # (B, C+K)
        vec_ids = jnp.stack([center, center], axis=1)                 # (B, 2); col1 unused
        table_vec, table_mat = emb_table, lin_weight
        split, share_vec = c, True
        pos_count, neg_count = b_total * c, b_total * k
    elif arch == "cbow":
        c = int(context.shape[1])
        mat_ids = context                                             # (B, C)
        vec_ids = jnp.stack([center, rand.reshape(b_total)], axis=1)  # (B, 2)
        table_vec, table_mat = lin_weight, emb_table
        split, share_vec = c, False
        pos_count, neg_count = b_total * c, b_total * c
    else:
        raise ValueError(f"Unknown architecture: {arch}")

    m = int(mat_ids.shape[1])

    # Resident-table budget check (the big structural win from the perf review).
    itemsize = jnp.dtype(table_vec.dtype).itemsize
    table_bytes = (int(table_vec.size) + int(table_mat.size)) * itemsize
    if table_bytes > 44 * 2**20:
        # TODO(synk): HBM-resident per-row-DMA gather fallback for huge tables.
        raise NotImplementedError("tables too large for the VMEM-resident path")

    # Batch tiling: tb is a sublane multiple (8) so blocked id specs are legal.
    tb = min(_round_up(max(1, int(batch_tile)), 8), _round_up(b_total, 8))
    num_tiles = (b_total + tb - 1) // tb
    b_pad = num_tiles * tb
    if b_pad != b_total:
        pad = b_pad - b_total
        mat_ids = jnp.pad(mat_ids, ((0, pad), (0, 0)))   # pad with valid id 0 (masked)
        vec_ids = jnp.pad(vec_ids, ((0, pad), (0, 0)))

    # Transpose the "matrix" table in the wrapper so the in-kernel scores matmul
    # is a plain (tb, E) @ (E, voc) dot.
    table_mat_t = jnp.transpose(table_mat)               # (E, voc)

    # VMEM budget: both tables (possibly double-buffered) + id blocks + scratch.
    # v5e/v6e have 128 MiB VMEM; v7x only 64 MiB -> cap the request.
    needed = 4 * table_bytes + 4 * tb * (m + 2) * 4 + 4 * tb * 4 + (1 << 20)
    vmem_limit = int(min(96 * 2**20, max(32 * 2**20, needed)))

    kernel = functools.partial(
        _w2v_kernel, tb=tb, m=m, voc=int(voc), split=split, share_vec=share_vec,
        b_total=b_total, pos_count=float(pos_count), neg_count=float(neg_count))

    loss = pl.pallas_call(
        kernel,
        out_shape=jax.ShapeDtypeStruct((1, 1), jnp.float32),
        grid=(num_tiles,),
        in_specs=[
            pl.BlockSpec((tb, m), lambda i: (i, 0)),           # per-tile column ids
            pl.BlockSpec((tb, 2), lambda i: (i, 0)),           # per-tile vec ids
            pl.BlockSpec((voc, emb_dim), lambda i: (0, 0)),    # resident table (vec)
            pl.BlockSpec((emb_dim, voc), lambda i: (0, 0)),    # resident table (mat^T)
        ],
        out_specs=pl.BlockSpec((1, 1), lambda i: (0, 0)),
        scratch_shapes=[
            pltpu.VMEM((tb, 1), jnp.float32),                  # acc_pos
            pltpu.VMEM((tb, 1), jnp.float32),                  # acc_neg
        ],
        compiler_params=pltpu.CompilerParams(
            dimension_semantics=("arbitrary",),                # accumulators carry
            vmem_limit_bytes=vmem_limit,
        ),
    )(mat_ids, vec_ids, table_vec, table_mat_t)
    return loss[0, 0]


def _reference_loss(arch, emb_table, lin_weight, center, context, rand):
    # Pure-JAX restatement of the torch forward (source of truth for the check).
    if arch == "skipgram":
        ie = emb_table[center]                      # (B, E)
        ow = lin_weight[context]                    # (B, C, E)
        rw = lin_weight[rand]                       # (B, K, E)
        dot = jnp.einsum("bme,be->bm", ow, ie)
        rdot = jnp.einsum("bme,be->bm", rw, ie)
    else:
        ie = emb_table[context]                     # (B, C, E)
        ow = lin_weight[center]                     # (B, E)
        rw = lin_weight[rand]                       # (B, E)
        dot = jnp.einsum("bme,be->bm", ie, ow)
        rdot = jnp.einsum("bme,be->bm", ie, rw)
    pos = -jnp.mean(jnp.log(jax.nn.sigmoid(dot)))
    neg = -jnp.mean(jnp.log(1.0 - jax.nn.sigmoid(rdot) + 1e-3))
    return pos + neg


if __name__ == "__main__":
    voc, emb_dim = 64, 32
    B, C, K = 10, 4, 6          # B deliberately NOT a multiple of 8 (exercises masking)

    key = jax.random.PRNGKey(0)
    k1, k2, k3, k4, k5, k6 = jax.random.split(key, 6)

    # Parameter init matching the torch module's shapes:
    #   Embedding(voc, emb).weight ~ N(0, 1)
    #   Linear(emb, voc, bias=False).weight ~ U(-1/sqrt(emb), 1/sqrt(emb))
    emb_table = jax.random.normal(k1, (voc, emb_dim), dtype=jnp.float32)
    bound = 1.0 / (emb_dim ** 0.5)
    lin_weight = jax.random.uniform(k2, (voc, emb_dim), dtype=jnp.float32,
                                    minval=-bound, maxval=bound)

    center = jax.random.randint(k3, (B,), 0, voc, dtype=jnp.int32)
    context = jax.random.randint(k4, (B, C), 0, voc, dtype=jnp.int32)
    rand_sg = jax.random.randint(k5, (B, K), 0, voc, dtype=jnp.int32)   # skipgram negatives
    rand_cb = jax.random.randint(k6, (B,), 0, voc, dtype=jnp.int32)     # cbow negative rows

    for arch, rnd in (("skipgram", rand_sg), ("cbow", rand_cb)):
        loss = word2vec_forward(arch, emb_table, lin_weight, center, context, rnd)
        loss = jax.block_until_ready(loss)
        ref = _reference_loss(arch, emb_table, lin_weight, center, context, rnd)
        assert jnp.allclose(loss, ref, rtol=1e-3, atol=1e-3), (arch, float(loss), float(ref))

    print("KERNEL_OK")
</pallas_src>

<mosaic_0001>
module attributes {stable_mosaic.version = 11 : i64} {
  func.func @_w2v_kernel(%arg0: i32, %arg1: memref<16x10xi32, #tpu.memory_space<vmem>>, %arg2: memref<16x2xi32, #tpu.memory_space<vmem>>, %arg3: memref<64x32xf32, #tpu.memory_space<vmem>>, %arg4: memref<32x64xf32, #tpu.memory_space<vmem>>, %arg5: memref<1x1xf32, #tpu.memory_space<vmem>>, %arg6: memref<16x1xf32, #tpu.memory_space<vmem>>, %arg7: memref<16x1xf32, #tpu.memory_space<vmem>>) attributes {dimension_semantics = [#tpu.dimension_semantics<arbitrary>], iteration_bounds = array<i64: 1>, scalar_prefetch = 0 : i64, scratch_operands = 2 : i64, tpu.core_type = #tpu.core_type<tc>, window_params = [{transform_indices = @transform_0, window_bounds = array<i64: 16, 10>}, {transform_indices = @transform_1, window_bounds = array<i64: 16, 2>}, {pipeline_mode = #tpu.pipeline_mode<synchronous>, transform_indices = @transform_2, window_bounds = array<i64: 64, 32>}, {pipeline_mode = #tpu.pipeline_mode<synchronous>, transform_indices = @transform_3, window_bounds = array<i64: 32, 64>}, {pipeline_mode = #tpu.pipeline_mode<synchronous>, transform_indices = @transform_4, window_bounds = array<i64: 1, 1>}]} {
    %c0_i32 = arith.constant 0 : i32
    %0 = arith.cmpi eq, %arg0, %c0_i32 : i32
    %1 = arith.extui %0 : i1 to i32
    %c0_i32_0 = arith.constant 0 : i32
    %2 = arith.cmpi ne, %1, %c0_i32_0 : i32
    scf.if %2 {
      %cst_77 = arith.constant 0.000000e+00 : f32
      %224 = vector.broadcast %cst_77 : f32 to vector<16x1xf32>
      %c0_78 = arith.constant 0 : index
      %c0_79 = arith.constant 0 : index
      %225 = vector.load %arg6[%c0_78, %c0_79] : memref<16x1xf32, #tpu.memory_space<vmem>>, vector<16x1xf32>
      tpu.vector_store %arg6[%c0_78, %c0_79], %224 {strides = array<i32>} : memref<16x1xf32, #tpu.memory_space<vmem>>, vector<16x1xf32>,
      %cst_80 = arith.constant 0.000000e+00 : f32
      %226 = vector.broadcast %cst_80 : f32 to vector<16x1xf32>
      %c0_81 = arith.constant 0 : index
      %c0_82 = arith.constant 0 : index
      %227 = vector.load %arg7[%c0_81, %c0_82] : memref<16x1xf32, #tpu.memory_space<vmem>>, vector<16x1xf32>
      tpu.vector_store %arg7[%c0_81, %c0_82], %226 {strides = array<i32>} : memref<16x1xf32, #tpu.memory_space<vmem>>, vector<16x1xf32>,
    } else {
    }
    %c0 = arith.constant 0 : index
    %c0_1 = arith.constant 0 : index
    %3 = vector.load %arg1[%c0, %c0_1] : memref<16x10xi32, #tpu.memory_space<vmem>>, vector<16x10xi32>
    %c0_2 = arith.constant 0 : index
    %c0_3 = arith.constant 0 : index
    %4 = vector.load %arg2[%c0_2, %c0_3] : memref<16x2xi32, #tpu.memory_space<vmem>>, vector<16x2xi32>
    %c0_4 = arith.constant 0 : index
    %c0_5 = arith.constant 0 : index
    %5 = vector.load %arg3[%c0_4, %c0_5] : memref<64x32xf32, #tpu.memory_space<vmem>>, vector<64x32xf32>
    %c0_6 = arith.constant 0 : index
    %c0_7 = arith.constant 0 : index
    %6 = vector.load %arg4[%c0_6, %c0_7] : memref<32x64xf32, #tpu.memory_space<vmem>>, vector<32x64xf32>
    %7 = tpu.iota {dimensions = array<i32: 1>} : vector<16x64xi32>
    %8 = vector.extract_strided_slice %4 {offsets = [0, 0], sizes = [16, 1], strides = [1, 1]} : vector<16x2xi32> to vector<16x1xi32>
    %9 = vector.broadcast %8 : vector<16x1xi32> to vector<16x64xi32>
    %10 = arith.cmpi eq, %9, %7 : vector<16x64xi32>
    %11 = arith.extui %10 : vector<16x64xi1> to vector<16x64xi32>
    %12 = arith.sitofp %11 : vector<16x64xi32> to vector<16x64xf32>
    %cst = arith.constant dense<0.000000e+00> : vector<16x32xf32>
    %13 = tpu.matmul %12, %5, %cst {dimension_numbers = #tpu.dot_dimension_numbers<[1], [0], [0], [1], [0, 0, 1, 1], [], []>} : vector<16x64xf32>, vector<64x32xf32>, vector<16x32xf32> -> vector<16x32xf32>
    %cst_8 = arith.constant dense<0.000000e+00> : vector<16x64xf32>
    %14 = tpu.matmul %13, %6, %cst_8 {dimension_numbers = #tpu.dot_dimension_numbers<[1], [0], [0], [1], [0, 0, 1, 1], [], []>} : vector<16x32xf32>, vector<32x64xf32>, vector<16x64xf32> -> vector<16x64xf32>
    %cst_9 = arith.constant 0.000000e+00 : f32
    %15 = vector.broadcast %cst_9 : f32 to vector<16x1xf32>
    %cst_10 = arith.constant 0.000000e+00 : f32
    %16 = vector.broadcast %cst_10 : f32 to vector<16x1xf32>
    %17 = vector.extract_strided_slice %3 {offsets = [0, 0], sizes = [16, 1], strides = [1, 1]} : vector<16x10xi32> to vector<16x1xi32>
    %18 = vector.broadcast %17 : vector<16x1xi32> to vector<16x64xi32>
    %19 = arith.cmpi eq, %18, %7 : vector<16x64xi32>
    %cst_11 = arith.constant 0.000000e+00 : f32
    %20 = vector.broadcast %cst_11 : f32 to vector<16x64xf32>
    %21 = arith.select %19, %14, %20 : vector<16x64xi1>, vector<16x64xf32>
    %cst_12 = arith.constant dense<0.000000e+00> : vector<16xf32>
    %22 = vector.multi_reduction <add>, %21, %cst_12 [1] : vector<16x64xf32> to vector<16xf32>
    %23 = vector.shape_cast %22 : vector<16xf32> to vector<16x1xf32>
    %cst_13 = arith.constant 0.000000e+00 : f32
    %24 = vector.broadcast %cst_13 : f32 to vector<16x1xf32>
    %25 = arith.subf %24, %23 : vector<16x1xf32>
    %cst_14 = arith.constant 0.000000e+00 : f32
    %26 = vector.broadcast %cst_14 : f32 to vector<16x1xf32>
    %27 = arith.maximumf %25, %26 : vector<16x1xf32>
    %28 = math.absf %25 : vector<16x1xf32>
    %cst_15 = arith.constant 0.000000e+00 : f32
    %29 = vector.broadcast %cst_15 : f32 to vector<16x1xf32>
    %30 = arith.subf %29, %28 : vector<16x1xf32>
    %31 = math.exp %30 : vector<16x1xf32>
    %cst_16 = arith.constant 1.000000e+00 : f32
    %32 = vector.broadcast %cst_16 : f32 to vector<16x1xf32>
    %33 = arith.addf %32, %31 : vector<16x1xf32>
    %34 = math.log %33 : vector<16x1xf32>
    %35 = arith.addf %27, %34 : vector<16x1xf32>
    %36 = arith.addf %15, %35 : vector<16x1xf32>
    %37 = vector.extract_strided_slice %3 {offsets = [0, 1], sizes = [16, 1], strides = [1, 1]} : vector<16x10xi32> to vector<16x1xi32>
    %38 = vector.broadcast %37 : vector<16x1xi32> to vector<16x64xi32>
    %39 = arith.cmpi eq, %38, %7 : vector<16x64xi32>
    %cst_17 = arith.constant 0.000000e+00 : f32
    %40 = vector.broadcast %cst_17 : f32 to vector<16x64xf32>
    %41 = arith.select %39, %14, %40 : vector<16x64xi1>, vector<16x64xf32>
    %cst_18 = arith.constant dense<0.000000e+00> : vector<16xf32>
    %42 = vector.multi_reduction <add>, %41, %cst_18 [1] : vector<16x64xf32> to vector<16xf32>
    %43 = vector.shape_cast %42 : vector<16xf32> to vector<16x1xf32>
    %cst_19 = arith.constant 0.000000e+00 : f32
    %44 = vector.broadcast %cst_19 : f32 to vector<16x1xf32>
    %45 = arith.subf %44, %43 : vector<16x1xf32>
    %cst_20 = arith.constant 0.000000e+00 : f32
    %46 = vector.broadcast %cst_20 : f32 to vector<16x1xf32>
    %47 = arith.maximumf %45, %46 : vector<16x1xf32>
    %48 = math.absf %45 : vector<16x1xf32>
    %cst_21 = arith.constant 0.000000e+00 : f32
    %49 = vector.broadcast %cst_21 : f32 to vector<16x1xf32>
    %50 = arith.subf %49, %48 : vector<16x1xf32>
    %51 = math.exp %50 : vector<16x1xf32>
    %cst_22 = arith.constant 1.000000e+00 : f32
    %52 = vector.broadcast %cst_22 : f32 to vector<16x1xf32>
    %53 = arith.addf %52, %51 : vector<16x1xf32>
    %54 = math.log %53 : vector<16x1xf32>
    %55 = arith.addf %47, %54 : vector<16x1xf32>
    %56 = arith.addf %36, %55 : vector<16x1xf32>
    %57 = vector.extract_strided_slice %3 {offsets = [0, 2], sizes = [16, 1], strides = [1, 1]} : vector<16x10xi32> to vector<16x1xi32>
    %58 = vector.broadcast %57 : vector<16x1xi32> to vector<16x64xi32>
    %59 = arith.cmpi eq, %58, %7 : vector<16x64xi32>
    %cst_23 = arith.constant 0.000000e+00 : f32
    %60 = vector.broadcast %cst_23 : f32 to vector<16x64xf32>
    %61 = arith.select %59, %14, %60 : vector<16x64xi1>, vector<16x64xf32>
    %cst_24 = arith.constant dense<0.000000e+00> : vector<16xf32>
    %62 = vector.multi_reduction <add>, %61, %cst_24 [1] : vector<16x64xf32> to vector<16xf32>
    %63 = vector.shape_cast %62 : vector<16xf32> to vector<16x1xf32>
    %cst_25 = arith.constant 0.000000e+00 : f32
    %64 = vector.broadcast %cst_25 : f32 to vector<16x1xf32>
    %65 = arith.subf %64, %63 : vector<16x1xf32>
    %cst_26 = arith.constant 0.000000e+00 : f32
    %66 = vector.broadcast %cst_26 : f32 to vector<16x1xf32>
    %67 = arith.maximumf %65, %66 : vector<16x1xf32>
    %68 = math.absf %65 : vector<16x1xf32>
    %cst_27 = arith.constant 0.000000e+00 : f32
    %69 = vector.broadcast %cst_27 : f32 to vector<16x1xf32>
    %70 = arith.subf %69, %68 : vector<16x1xf32>
    %71 = math.exp %70 : vector<16x1xf32>
    %cst_28 = arith.constant 1.000000e+00 : f32
    %72 = vector.broadcast %cst_28 : f32 to vector<16x1xf32>
    %73 = arith.addf %72, %71 : vector<16x1xf32>
    %74 = math.log %73 : vector<16x1xf32>
    %75 = arith.addf %67, %74 : vector<16x1xf32>
    %76 = arith.addf %56, %75 : vector<16x1xf32>
    %77 = vector.extract_strided_slice %3 {offsets = [0, 3], sizes = [16, 1], strides = [1, 1]} : vector<16x10xi32> to vector<16x1xi32>
    %78 = vector.broadcast %77 : vector<16x1xi32> to vector<16x64xi32>
    %79 = arith.cmpi eq, %78, %7 : vector<16x64xi32>
    %cst_29 = arith.constant 0.000000e+00 : f32
    %80 = vector.broadcast %cst_29 : f32 to vector<16x64xf32>
    %81 = arith.select %79, %14, %80 : vector<16x64xi1>, vector<16x64xf32>
    %cst_30 = arith.constant dense<0.000000e+00> : vector<16xf32>
    %82 = vector.multi_reduction <add>, %81, %cst_30 [1] : vector<16x64xf32> to vector<16xf32>
    %83 = vector.shape_cast %82 : vector<16xf32> to vector<16x1xf32>
    %cst_31 = arith.constant 0.000000e+00 : f32
    %84 = vector.broadcast %cst_31 : f32 to vector<16x1xf32>
    %85 = arith.subf %84, %83 : vector<16x1xf32>
    %cst_32 = arith.constant 0.000000e+00 : f32
    %86 = vector.broadcast %cst_32 : f32 to vector<16x1xf32>
    %87 = arith.maximumf %85, %86 : vector<16x1xf32>
    %88 = math.absf %85 : vector<16x1xf32>
    %cst_33 = arith.constant 0.000000e+00 : f32
    %89 = vector.broadcast %cst_33 : f32 to vector<16x1xf32>
    %90 = arith.subf %89, %88 : vector<16x1xf32>
    %91 = math.exp %90 : vector<16x1xf32>
    %cst_34 = arith.constant 1.000000e+00 : f32
    %92 = vector.broadcast %cst_34 : f32 to vector<16x1xf32>
    %93 = arith.addf %92, %91 : vector<16x1xf32>
    %94 = math.log %93 : vector<16x1xf32>
    %95 = arith.addf %87, %94 : vector<16x1xf32>
    %96 = arith.addf %76, %95 : vector<16x1xf32>
    %97 = vector.extract_strided_slice %3 {offsets = [0, 4], sizes = [16, 1], strides = [1, 1]} : vector<16x10xi32> to vector<16x1xi32>
    %98 = vector.broadcast %97 : vector<16x1xi32> to vector<16x64xi32>
    %99 = arith.cmpi eq, %98, %7 : vector<16x64xi32>
    %cst_35 = arith.constant 0.000000e+00 : f32
    %100 = vector.broadcast %cst_35 : f32 to vector<16x64xf32>
    %101 = arith.select %99, %14, %100 : vector<16x64xi1>, vector<16x64xf32>
    %cst_36 = arith.constant dense<0.000000e+00> : vector<16xf32>
    %102 = vector.multi_reduction <add>, %101, %cst_36 [1] : vector<16x64xf32> to vector<16xf32>
    %103 = vector.shape_cast %102 : vector<16xf32> to vector<16x1xf32>
    %cst_37 = arith.constant 0.000000e+00 : f32
    %104 = vector.broadcast %cst_37 : f32 to vector<16x1xf32>
    %105 = arith.subf %104, %103 : vector<16x1xf32>
    %106 = arith.negf %105 : vector<16x1xf32>
    %107 = math.exp %106 : vector<16x1xf32>
    %cst_38 = arith.constant 1.000000e+00 : f32
    %108 = vector.broadcast %cst_38 : f32 to vector<16x1xf32>
    %109 = arith.addf %108, %107 : vector<16x1xf32>
    %110 = arith.divf %108, %109 : vector<16x1xf32>
    %cst_39 = arith.constant 1.000000e-03 : f32
    %111 = vector.broadcast %cst_39 : f32 to vector<16x1xf32>
    %112 = arith.addf %110, %111 : vector<16x1xf32>
    %113 = math.log %112 : vector<16x1xf32>
    %114 = arith.subf %16, %113 : vector<16x1xf32>
    %115 = vector.extract_strided_slice %3 {offsets = [0, 5], sizes = [16, 1], strides = [1, 1]} : vector<16x10xi32> to vector<16x1xi32>
    %116 = vector.broadcast %115 : vector<16x1xi32> to vector<16x64xi32>
    %117 = arith.cmpi eq, %116, %7 : vector<16x64xi32>
    %cst_40 = arith.constant 0.000000e+00 : f32
    %118 = vector.broadcast %cst_40 : f32 to vector<16x64xf32>
    %119 = arith.select %117, %14, %118 : vector<16x64xi1>, vector<16x64xf32>
    %cst_41 = arith.constant dense<0.000000e+00> : vector<16xf32>
    %120 = vector.multi_reduction <add>, %119, %cst_41 [1] : vector<16x64xf32> to vector<16xf32>
    %121 = vector.shape_cast %120 : vector<16xf32> to vector<16x1xf32>
    %cst_42 = arith.constant 0.000000e+00 : f32
    %122 = vector.broadcast %cst_42 : f32 to vector<16x1xf32>
    %123 = arith.subf %122, %121 : vector<16x1xf32>
    %124 = arith.negf %123 : vector<16x1xf32>
    %125 = math.exp %124 : vector<16x1xf32>
    %cst_43 = arith.constant 1.000000e+00 : f32
    %126 = vector.broadcast %cst_43 : f32 to vector<16x1xf32>
    %127 = arith.addf %126, %125 : vector<16x1xf32>
    %128 = arith.divf %126, %127 : vector<16x1xf32>
    %cst_44 = arith.constant 1.000000e-03 : f32
    %129 = vector.broadcast %cst_44 : f32 to vector<16x1xf32>
    %130 = arith.addf %128, %129 : vector<16x1xf32>
    %131 = math.log %130 : vector<16x1xf32>
    %132 = arith.subf %114, %131 : vector<16x1xf32>
    %133 = vector.extract_strided_slice %3 {offsets = [0, 6], sizes = [16, 1], strides = [1, 1]} : vector<16x10xi32> to vector<16x1xi32>
    %134 = vector.broadcast %133 : vector<16x1xi32> to vector<16x64xi32>
    %135 = arith.cmpi eq, %134, %7 : vector<16x64xi32>
    %cst_45 = arith.constant 0.000000e+00 : f32
    %136 = vector.broadcast %cst_45 : f32 to vector<16x64xf32>
    %137 = arith.select %135, %14, %136 : vector<16x64xi1>, vector<16x64xf32>
    %cst_46 = arith.constant dense<0.000000e+00> : vector<16xf32>
    %138 = vector.multi_reduction <add>, %137, %cst_46 [1] : vector<16x64xf32> to vector<16xf32>
    %139 = vector.shape_cast %138 : vector<16xf32> to vector<16x1xf32>
    %cst_47 = arith.constant 0.000000e+00 : f32
    %140 = vector.broadcast %cst_47 : f32 to vector<16x1xf32>
    %141 = arith.subf %140, %139 : vector<16x1xf32>
    %142 = arith.negf %141 : vector<16x1xf32>
    %143 = math.exp %142 : vector<16x1xf32>
    %cst_48 = arith.constant 1.000000e+00 : f32
    %144 = vector.broadcast %cst_48 : f32 to vector<16x1xf32>
    %145 = arith.addf %144, %143 : vector<16x1xf32>
    %146 = arith.divf %144, %145 : vector<16x1xf32>
    %cst_49 = arith.constant 1.000000e-03 : f32
    %147 = vector.broadcast %cst_49 : f32 to vector<16x1xf32>
    %148 = arith.addf %146, %147 : vector<16x1xf32>
    %149 = math.log %148 : vector<16x1xf32>
    %150 = arith.subf %132, %149 : vector<16x1xf32>
    %151 = vector.extract_strided_slice %3 {offsets = [0, 7], sizes = [16, 1], strides = [1, 1]} : vector<16x10xi32> to vector<16x1xi32>
    %152 = vector.broadcast %151 : vector<16x1xi32> to vector<16x64xi32>
    %153 = arith.cmpi eq, %152, %7 : vector<16x64xi32>
    %cst_50 = arith.constant 0.000000e+00 : f32
    %154 = vector.broadcast %cst_50 : f32 to vector<16x64xf32>
    %155 = arith.select %153, %14, %154 : vector<16x64xi1>, vector<16x64xf32>
    %cst_51 = arith.constant dense<0.000000e+00> : vector<16xf32>
    %156 = vector.multi_reduction <add>, %155, %cst_51 [1] : vector<16x64xf32> to vector<16xf32>
    %157 = vector.shape_cast %156 : vector<16xf32> to vector<16x1xf32>
    %cst_52 = arith.constant 0.000000e+00 : f32
    %158 = vector.broadcast %cst_52 : f32 to vector<16x1xf32>
    %159 = arith.subf %158, %157 : vector<16x1xf32>
    %160 = arith.negf %159 : vector<16x1xf32>
    %161 = math.exp %160 : vector<16x1xf32>
    %cst_53 = arith.constant 1.000000e+00 : f32
    %162 = vector.broadcast %cst_53 : f32 to vector<16x1xf32>
    %163 = arith.addf %162, %161 : vector<16x1xf32>
    %164 = arith.divf %162, %163 : vector<16x1xf32>
    %cst_54 = arith.constant 1.000000e-03 : f32
    %165 = vector.broadcast %cst_54 : f32 to vector<16x1xf32>
    %166 = arith.addf %164, %165 : vector<16x1xf32>
    %167 = math.log %166 : vector<16x1xf32>
    %168 = arith.subf %150, %167 : vector<16x1xf32>
    %169 = vector.extract_strided_slice %3 {offsets = [0, 8], sizes = [16, 1], strides = [1, 1]} : vector<16x10xi32> to vector<16x1xi32>
    %170 = vector.broadcast %169 : vector<16x1xi32> to vector<16x64xi32>
    %171 = arith.cmpi eq, %170, %7 : vector<16x64xi32>
    %cst_55 = arith.constant 0.000000e+00 : f32
    %172 = vector.broadcast %cst_55 : f32 to vector<16x64xf32>
    %173 = arith.select %171, %14, %172 : vector<16x64xi1>, vector<16x64xf32>
    %cst_56 = arith.constant dense<0.000000e+00> : vector<16xf32>
    %174 = vector.multi_reduction <add>, %173, %cst_56 [1] : vector<16x64xf32> to vector<16xf32>
    %175 = vector.shape_cast %174 : vector<16xf32> to vector<16x1xf32>
    %cst_57 = arith.constant 0.000000e+00 : f32
    %176 = vector.broadcast %cst_57 : f32 to vector<16x1xf32>
    %177 = arith.subf %176, %175 : vector<16x1xf32>
    %178 = arith.negf %177 : vector<16x1xf32>
    %179 = math.exp %178 : vector<16x1xf32>
    %cst_58 = arith.constant 1.000000e+00 : f32
    %180 = vector.broadcast %cst_58 : f32 to vector<16x1xf32>
    %181 = arith.addf %180, %179 : vector<16x1xf32>
    %182 = arith.divf %180, %181 : vector<16x1xf32>
    %cst_59 = arith.constant 1.000000e-03 : f32
    %183 = vector.broadcast %cst_59 : f32 to vector<16x1xf32>
    %184 = arith.addf %182, %183 : vector<16x1xf32>
    %185 = math.log %184 : vector<16x1xf32>
    %186 = arith.subf %168, %185 : vector<16x1xf32>
    %187 = vector.extract_strided_slice %3 {offsets = [0, 9], sizes = [16, 1], strides = [1, 1]} : vector<16x10xi32> to vector<16x1xi32>
    %188 = vector.broadcast %187 : vector<16x1xi32> to vector<16x64xi32>
    %189 = arith.cmpi eq, %188, %7 : vector<16x64xi32>
    %cst_60 = arith.constant 0.000000e+00 : f32
    %190 = vector.broadcast %cst_60 : f32 to vector<16x64xf32>
    %191 = arith.select %189, %14, %190 : vector<16x64xi1>, vector<16x64xf32>
    %cst_61 = arith.constant dense<0.000000e+00> : vector<16xf32>
    %192 = vector.multi_reduction <add>, %191, %cst_61 [1] : vector<16x64xf32> to vector<16xf32>
    %193 = vector.shape_cast %192 : vector<16xf32> to vector<16x1xf32>
    %cst_62 = arith.constant 0.000000e+00 : f32
    %194 = vector.broadcast %cst_62 : f32 to vector<16x1xf32>
    %195 = arith.subf %194, %193 : vector<16x1xf32>
    %196 = arith.negf %195 : vector<16x1xf32>
    %197 = math.exp %196 : vector<16x1xf32>
    %cst_63 = arith.constant 1.000000e+00 : f32
    %198 = vector.broadcast %cst_63 : f32 to vector<16x1xf32>
    %199 = arith.addf %198, %197 : vector<16x1xf32>
    %200 = arith.divf %198, %199 : vector<16x1xf32>
    %cst_64 = arith.constant 1.000000e-03 : f32
    %201 = vector.broadcast %cst_64 : f32 to vector<16x1xf32>
    %202 = arith.addf %200, %201 : vector<16x1xf32>
    %203 = math.log %202 : vector<16x1xf32>
    %204 = arith.subf %186, %203 : vector<16x1xf32>
    %c16_i32 = arith.constant 16 : i32
    %205 = arith.muli %arg0, %c16_i32 : i32
    %206 = tpu.iota {dimensions = array<i32: 0>} : vector<16x1xi32>
    %207 = vector.broadcast %205 : i32 to vector<16x1xi32>
    %208 = arith.addi %207, %206 : vector<16x1xi32>
    %c10_i32 = arith.constant 10 : i32
    %209 = vector.broadcast %c10_i32 : i32 to vector<16x1xi32>
    %210 = arith.cmpi slt, %208, %209 : vector<16x1xi32>
    %c0_65 = arith.constant 0 : index
    %c0_66 = arith.constant 0 : index
    %211 = vector.load %arg6[%c0_65, %c0_66] : memref<16x1xf32, #tpu.memory_space<vmem>>, vector<16x1xf32>
    %cst_67 = arith.constant 0.000000e+00 : f32
    %212 = vector.broadcast %cst_67 : f32 to vector<16x1xf32>
    %213 = arith.select %210, %96, %212 : vector<16x1xi1>, vector<16x1xf32>
    %214 = arith.addf %211, %213 : vector<16x1xf32>
    %c0_68 = arith.constant 0 : index
    %c0_69 = arith.constant 0 : index
    %215 = vector.load %arg6[%c0_68, %c0_69] : memref<16x1xf32, #tpu.memory_space<vmem>>, vector<16x1xf32>
    tpu.vector_store %arg6[%c0_68, %c0_69], %214 {strides = array<i32>} : memref<16x1xf32, #tpu.memory_space<vmem>>, vector<16x1xf32>,
    %c0_70 = arith.constant 0 : index
    %c0_71 = arith.constant 0 : index
    %216 = vector.load %arg7[%c0_70, %c0_71] : memref<16x1xf32, #tpu.memory_space<vmem>>, vector<16x1xf32>
    %cst_72 = arith.constant 0.000000e+00 : f32
    %217 = vector.broadcast %cst_72 : f32 to vector<16x1xf32>
    %218 = arith.select %210, %204, %217 : vector<16x1xi1>, vector<16x1xf32>
    %219 = arith.addf %216, %218 : vector<16x1xf32>
    %c0_73 = arith.constant 0 : index
    %c0_74 = arith.constant 0 : index
    %220 = vector.load %arg7[%c0_73, %c0_74] : memref<16x1xf32, #tpu.memory_space<vmem>>, vector<16x1xf32>
    tpu.vector_store %arg7[%c0_73, %c0_74], %219 {strides = array<i32>} : memref<16x1xf32, #tpu.memory_space<vmem>>, vector<16x1xf32>,
    %c0_i32_75 = arith.constant 0 : i32
    %221 = arith.cmpi eq, %arg0, %c0_i32_75 : i32
    %222 = arith.extui %221 : i1 to i32
    %c0_i32_76 = arith.constant 0 : i32
    %223 = arith.cmpi ne, %222, %c0_i32_76 : i32
    scf.if %223 {
      %c0_77 = arith.constant 0 : index
      %c0_78 = arith.constant 0 : index
      %224 = vector.load %arg6[%c0_77, %c0_78] : memref<16x1xf32, #tpu.memory_space<vmem>>, vector<16x1xf32>
      %225 = vector.shape_cast %224 : vector<16x1xf32> to vector<1x16x1xf32>
      %cst_79 = arith.constant dense<0.000000e+00> : vector<1xf32>
      %226 = vector.multi_reduction <add>, %225, %cst_79 [1, 2] : vector<1x16x1xf32> to vector<1xf32>
      %227 = vector.shape_cast %226 : vector<1xf32> to vector<1x1x1xf32>
      %228 = vector.extract %227[0, 0, 0] : f32 from vector<1x1x1xf32>
      %229 = vector.broadcast %228 : f32 to vector<1x1xf32>
      %cst_80 = arith.constant 2.500000e-02 : f32
      %230 = vector.broadcast %cst_80 : f32 to vector<1x1xf32>
      %231 = arith.mulf %229, %230 : vector<1x1xf32>
      %c0_81 = arith.constant 0 : index
      %c0_82 = arith.constant 0 : index
      %232 = vector.load %arg7[%c0_81, %c0_82] : memref<16x1xf32, #tpu.memory_space<vmem>>, vector<16x1xf32>
      %233 = vector.shape_cast %232 : vector<16x1xf32> to vector<1x16x1xf32>
      %cst_83 = arith.constant dense<0.000000e+00> : vector<1xf32>
      %234 = vector.multi_reduction <add>, %233, %cst_83 [1, 2] : vector<1x16x1xf32> to vector<1xf32>
      %235 = vector.shape_cast %234 : vector<1xf32> to vector<1x1x1xf32>
      %236 = vector.extract %235[0, 0, 0] : f32 from vector<1x1x1xf32>
      %237 = vector.broadcast %236 : f32 to vector<1x1xf32>
      %cst_84 = arith.constant 0.0166666675 : f32
      %238 = vector.broadcast %cst_84 : f32 to vector<1x1xf32>
      %239 = arith.mulf %237, %238 : vector<1x1xf32>
      %240 = arith.addf %231, %239 : vector<1x1xf32>
      %c0_85 = arith.constant 0 : index
      %c0_86 = arith.constant 0 : index
      %241 = vector.load %arg5[%c0_85, %c0_86] : memref<1x1xf32, #tpu.memory_space<vmem>>, vector<1x1xf32>
      tpu.vector_store %arg5[%c0_85, %c0_86], %240 {strides = array<i32>} : memref<1x1xf32, #tpu.memory_space<vmem>>, vector<1x1xf32>,
    } else {
    }
    return
  }
  func.func @transform_0(%arg0: i32) -> (i32, i32) {
    %c0_i32 = arith.constant 0 : i32
    %c0_i32_0 = arith.constant 0 : i32
    return %arg0, %c0_i32 : i32, i32
  }
  func.func @transform_1(%arg0: i32) -> (i32, i32) {
    %c0_i32 = arith.constant 0 : i32
    %c0_i32_0 = arith.constant 0 : i32
    return %arg0, %c0_i32 : i32, i32
  }
  func.func @transform_2(%arg0: i32) -> (i32, i32) {
    %c0_i32 = arith.constant 0 : i32
    %c0_i32_0 = arith.constant 0 : i32
    %c0_i32_1 = arith.constant 0 : i32
    return %c0_i32, %c0_i32_0 : i32, i32
  }
  func.func @transform_3(%arg0: i32) -> (i32, i32) {
    %c0_i32 = arith.constant 0 : i32
    %c0_i32_0 = arith.constant 0 : i32
    %c0_i32_1 = arith.constant 0 : i32
    return %c0_i32, %c0_i32_0 : i32, i32
  }
  func.func @transform_4(%arg0: i32) -> (i32, i32) {
    %c0_i32 = arith.constant 0 : i32
    %c0_i32_0 = arith.constant 0 : i32
    %c0_i32_1 = arith.constant 0 : i32
    return %c0_i32, %c0_i32_0 : i32, i32
  }
}

</mosaic_0001>

<bundles_post_ra>
// kernel: tpu_custom_call.1
= control target key start
LH: loop header
LB: loop body
LE: loop exit
PB: predicated region body
PF: predicated region fallthrough
CT: control target
= control target key end

     0   :  { %v926_v2 = vmov 0   ;;  %vm22_vm0 = vcmask 7168   ;;  %s1174_s0 = inlined_call_operand.vmem [shape: s32[16,10], index: 0, kind: input, shape index: {}]   ;;  %s1175_s1 = inlined_call_operand.vmem [shape: s32[16,2], index: 1, kind: input, shape index: {}]   ;;  %s1176_s2 = inlined_call_operand.vmem [shape: f32[64,32], index: 2, kind: input, shape index: {}]   ;;  %s1177_s3 = inlined_call_operand.vmem [shape: f32[32,64], index: 3, kind: input, shape index: {}]   ;;  %s1178_s4 = inlined_call_operand.hbm [shape: f32[1,1], index: 4, kind: output, shape index: {}]  }
   0x1   :  { %v29_v0 = vld [vmem:[%s1175_s1] sm:$0xff]  ;;  %783 = vset.pattern.permute.xlu0 %v926_v2  ;;  %v32_v3 = vld [vmem:[%s1176_s2 + $0x8] sm:$0xff]  ;;  %v33_v4 = vld [vmem:[%s1176_s2 + $0x10] sm:$0xff]  ;;  %784 = vset.pattern.permute.xlu1 %v926_v2 }
   0x2   :  { %v31_v1 = vld [vmem:[%s1176_s2] sm:$0xff]  ;;  %v34_v5 = vld [vmem:[%s1176_s2 + $0x18] sm:$0xff]  ;;  %46 = vperm.xlu0 %783, %v29_v0   ;;  %v30_v6 = vld [vmem:[%s1175_s1 + $0x8] sm:$0xff] }
   0x3   :  { %v743_v7 = vpack.c.bf16 %v32_v3, %v31_v1  ;;  %v747_v8 = vpack.c.bf16 %v34_v5, %v33_v4  ;;  %v35_v9 = vld [vmem:[%s1176_s2 + $0x20] sm:$0xff]  ;;  %v36_v10 = vld [vmem:[%s1176_s2 + $0x28] sm:$0xff] }
   0x4   :  { %9 = vsyncpa [#allocation5], 0  ;;  %v927_v11 = vmov 0.0   ;;  %v751_v12 = vpack.c.bf16 %v36_v10, %v35_v9  ;;  %v37_v13 = vld [vmem:[%s1176_s2 + $0x30] sm:$0xff]  ;;  %v38_v14 = vld [vmem:[%s1176_s2 + $0x38] sm:$0xff]  ;;  %v43_v22 = vlaneseq  ;;  %vm57_vm1 = vcmask 523264  }
   0x5   :  { %744 = vmatprep.subr.bf16.mxu0 %v743_v7  ;;  %25 = vst.msk [vmem:[#allocation3] sm:$0xff] %vm22_vm0, %v927_v11  ;;  %26 = vst.msk [vmem:[#allocation3 + $0x8] sm:$0xff] %vm22_vm0, %v927_v11  ;;  %v39_v15 = vld [vmem:[%s1177_s3] sm:$0xff]  ;;  %v40_v16 = vld [vmem:[%s1177_s3 + $0x8] sm:$0xff]  ;;  %v755_v20 = vpack.c.bf16 %v38_v14, %v37_v13  ;;  %v928_v29 = vmov 1   ;;  %v929_v31 = vmov 4  }
   0x6   :  { %23 = vst.msk [vmem:[#allocation2] sm:$0xff] %vm22_vm0, %v927_v11  ;;  %24 = vst.msk [vmem:[#allocation2 + $0x8] sm:$0xff] %vm22_vm0, %v927_v11  ;;  %746 = vmatpush3.bf16.msra.mxu0 %v743_v7  ;;  %49 = vperm.xlu0 %783, %v30_v6   ;;  %v41_v17 = vld [vmem:[%s1177_s3 + $0x10] sm:$0xff]  ;;  %v759_v18 = vpack.c.bf16 %v40_v16, %v39_v15  ;;  %v42_v19 = vld [vmem:[%s1177_s3 + $0x18] sm:$0xff]  ;;  %v1010_v23 = vand.u32 127, %v43_v22  ;;  %v930_v32 = vmov 2  }
   0x7   :  { %748 = vmatprep.subr.bf16.mxu0 %v747_v8  ;;  %v763_v21 = vpack.c.bf16 %v42_v19, %v41_v17  ;;  %v27_v28 = vld [vmem:[%s1174_s0] sm:$0xff]  ;;  %v28_v30 = vld [vmem:[%s1174_s0 + $0x8] sm:$0xff]  ;;  %v931_v33 = vmov 9   ;;  %v932_v34 = vmov 5   ;;  %v933_v35 = vmov 6   ;;  %s937_s19 = smov [#allocation4]  }
   0x8   :  { %760 = vmatprep.subr.bf16.mxu1 %v759_v18  ;;  %222 = vperm.xlu1 %784, %v27_v28   ;;  %v934_v36 = vmov 7   ;;  %v935_v37 = vmov 8   ;;  %v936_v38 = vmov 3   ;;  %vm139_vm4 = vcmask 261120   ;;  %s671_s20 = sshll.u32 %s937_s19, 4  ;;  %s672_s20 = int_to_ptr.vmem [resolvable:$true] %s671_s20 }
   0x9   :  { %762 = vmatpush3.bf16.msra.mxu1 %v759_v18  ;;  %s902_s21 = scalar_lea.vmem %s672_s20, 16  ;;  %s906_s22 = scalar_lea.vmem %s672_s20, 32 }
   0xa   :  { %750 = vmatpush3.bf16.msra.mxu0 %v747_v8  ;;  %764 = vmatprep.subr.bf16.mxu1 %v763_v21  ;;  %p903_p0 = scmp.ne.s32.totalorder %s672_s20, %s902_s21  ;;  %p907_p1 = scmp.lt.s32.totalorder %s672_s20, %s672_s20 }
   0xb   :  { %752 = vmatprep.subr.bf16.mxu0 %v751_v12  ;;  %785 = vset.pattern.permute.xlu0 %v928_v29  ;;  %p908_p2 = scmp.lt.s32.totalorder %s906_s22, %s902_s21 }
   0xc   :  { %260 = vperm.xlu0 %785, %v27_v28   ;;  %225 = vperm.xlu1 %784, %v28_v30  }
   0xd   :  { %766 = vmatpush3.bf16.msra.mxu1 %v763_v21  ;;  %p909_p3 = por %p908_p2, %p907_p1 }
   0xe   :  { %754 = vmatpush3.bf16.msra.mxu0 %v751_v12 }
   0xf   :  { %756 = vmatprep.subr.bf16.mxu0 %v755_v20  ;;  %p910_p4 = pnand %p909_p3, %p903_p0 }
  0x10   :  { %788 = vset.pattern.permute.xlu0 %v929_v31  ;;  %786 = vset.pattern.permute.xlu1 %v928_v29 }
  0x11   :  { %377 = vperm.xlu0 %788, %v28_v30   ;;  %263 = vperm.xlu1 %786, %v28_v30  }
  0x12   :  { %758 = vmatpush3.bf16.msra.mxu0 %v755_v20 }
  0x15   :  { %795 = vset.pattern.permute.xlu0 %v930_v32  ;;  %787 = vset.pattern.permute.xlu1 %v930_v32 }
  0x16   :  { %301 = vperm.xlu0 %795, %v28_v30   ;;  %298 = vperm.xlu1 %787, %v27_v28  }
  0x1a   :  { %797 = vset.pattern.permute.xlu0 %v931_v33  ;;  %789 = vset.pattern.permute.xlu1 %v929_v31 }
  0x1b   :  { %374 = vperm.xlu1 %789, %v27_v28  }
  0x1f   :  { %790 = vset.pattern.permute.xlu1 %v932_v34 }
  0x20   :  { %415 = vperm.xlu1 %790, %v28_v30  }
  0x24   :  { %412 = vperm.xlu1 %790, %v27_v28  }
  0x28   :  { %791 = vset.pattern.permute.xlu1 %v933_v35 }
  0x29   :  { %453 = vperm.xlu1 %791, %v28_v30  }
  0x2d   :  { %450 = vperm.xlu1 %791, %v27_v28  }
  0x31   :  { %792 = vset.pattern.permute.xlu1 %v934_v36 }
  0x32   :  { %491 = vperm.xlu1 %792, %v28_v30  }
  0x36   :  { %488 = vperm.xlu1 %792, %v27_v28  }
  0x3a   :  { %793 = vset.pattern.permute.xlu1 %v935_v37 }
  0x3b   :  { %529 = vperm.xlu1 %793, %v28_v30  }
  0x3f   :  { %526 = vperm.xlu1 %793, %v27_v28  }
  0x43   :  { %794 = vset.pattern.permute.xlu1 %v931_v33 }
  0x44   :  { %567 = vperm.xlu1 %794, %v28_v30  }
  0x48   :  { %564 = vperm.xlu1 %794, %v27_v28  }
  0x4c   :  { %796 = vset.pattern.permute.xlu1 %v936_v38 }
  0x4d   :  { %339 = vperm.xlu1 %796, %v28_v30  }
  0x51   :  { %336 = vperm.xlu1 %796, %v27_v28  }
  0x81   :  { %v47_v24 = vpop.permute.xlu0 %46 }
  0x82   :  { %vm51_vm2 = vcmp.eq.s32.totalorder %v47_v24, %v1010_v23 }
  0x83   :  { %v679_v25 = vsel %vm51_vm2, 1.0, %v927_v11 }
  0x84   :  { %729 = vmatprep.mubr.msk.f32.mxu0 %vm57_vm1, %v679_v25 }
  0x85   :  { %v50_v26 = vpop.permute.xlu0 %49 }
  0x86   :  { %vm52_vm3 = vcmp.eq.s32.totalorder %v50_v26, %v1010_v23 }
  0x87   :  { %v680_v27 = vsel %vm52_vm3, 1.0, %v927_v11  ;;  %v223_v41 = vpop.permute.xlu1 %222 }
  0x88   :  { %730 = vmatmul.mubr.msk.f32.vlgmr.msra.gmra.mrb[0].mxu0 %vm57_vm1, %v680_v27  ;;  %vm227_vm11 = vcmp.eq.s32.totalorder %v223_v41, %v1010_v23 }
  0x8b   :  { %v226_v42 = vpop.permute.xlu1 %225  ;;  %v261_v51 = vpop.permute.xlu0 %260 }
  0x8c   :  { %vm228_vm5 = vcmp.eq.s32.totalorder %v226_v42, %v1010_v23  ;;  %vm265_vm12 = vcmp.eq.s32.totalorder %v261_v51, %v1010_v23 }
  0x90   :  { %v264_v43 = vpop.permute.xlu1 %263  ;;  %v378_v53 = vpop.permute.xlu0 %377 }
  0x91   :  { %vm266_vm6 = vcmp.eq.s32.totalorder %v264_v43, %v1010_v23  ;;  %vm380_vm8 = vcmp.eq.s32.totalorder %v378_v53, %v1010_v23 }
  0x95   :  { %v1022_v44 = vpop.permute.xlu1 %298  ;;  %v302_v18 = vpop.permute.xlu0 %301 }
  0x9a   :  { %v375_v45 = vpop.permute.xlu1 %374 }
  0x9b   :  { %vm379_vm13 = vcmp.eq.s32.totalorder %v375_v45, %v1010_v23 }
  0x9f   :  { %v416_v46 = vpop.permute.xlu1 %415 }
  0xa0   :  { %vm418_vm10 = vcmp.eq.s32.totalorder %v416_v46, %v1010_v23 }
  0xa3   :  { %v413_v47 = vpop.permute.xlu1 %412 }
  0xa4   :  { %vm417_vm14 = vcmp.eq.s32.totalorder %v413_v47, %v1010_v23 }
  0xa8   :  { %v454_v48 = vpop.permute.xlu1 %453 }
  0xa9   :  { %vm456_vm7 = vcmp.eq.s32.totalorder %v454_v48, %v1010_v23 }
  0xac   :  { %v451_v49 = vpop.permute.xlu1 %450 }
  0xad   :  { %vm455_vm15 = vcmp.eq.s32.totalorder %v451_v49, %v1010_v23 }
  0xb1   :  { %v492_v50 = vpop.permute.xlu1 %491 }
  0xb2   :  { %vm494_vm9 = vcmp.eq.s32.totalorder %v492_v50, %v1010_v23 }
  0xb5   :  { %v489_v52 = vpop.permute.xlu1 %488 }
  0xb6   :  { %vm493_vm3 = vcmp.eq.s32.totalorder %v489_v52, %v1010_v23 }
  0xba   :  { %v530_v60 = vpop.permute.xlu1 %529 }
  0xbb   :  { %vm532_vm2 = vcmp.eq.s32.totalorder %v530_v60, %v1010_v23 }
  0xbe   :  { %v527_v3 = vpop.permute.xlu1 %526 }
  0xc3   :  { %v568_v10 = vpop.permute.xlu1 %567 }
  0xc7   :  { %v565_v17 = vpop.permute.xlu1 %564 }
  0xcc   :  { %v340_v27 = vpop.permute.xlu1 %339 }
  0xd0   :  { %v337_v34 = vpop.permute.xlu1 %336 }
 0x15b   :  { %v731_v39 = vpop.f32.mrb[0].mxu0 }
 0x15c   :  { %v130_v40 = vpop.f32.mrb[1].mxu0 }
 0x15d   :  { %740 = vmatprep.mubr.msk.f32.mxu1 %vm139_vm4, %v130_v40 }
 0x15e   :  { %741 = vmatmul.mubr.msk.f32.vlgmr.msra.gmra.mrb[0].mxu1 %vm139_vm4, %v731_v39  ;;  %vm570_vm4 = vcmp.eq.s32.totalorder %v568_v10, %v1010_v23 }
 0x231   :  { %v1028_v54 = vpop.f32.mrb[0].mxu1 }
 0x232   :  { %v1030_v55 = vpop.f32.mrb[1].mxu1  ;;  %v268_v56 = vsel %vm266_vm6, %v1028_v54, 0.0  ;;  %v230_v57 = vsel %vm228_vm5, %v1028_v54, 0.0  ;;  %v382_v61 = vsel %vm380_vm8, %v1028_v54, 0.0  ;;  %v458_v62 = vsel %vm456_vm7, %v1028_v54, 0.0 }
 0x233   :  { %v272_v58 = vsel %vm57_vm1, %v268_v56, 0.0  ;;  %v234_v59 = vsel %vm57_vm1, %v230_v57, 0.0  ;;  %v386_v63 = vsel %vm57_vm1, %v382_v61, 0.0  ;;  %v462_v0 = vsel %vm57_vm1, %v458_v62, 0.0 }
 0x234   :  { %273 = vadd.xlane.f32.xlu0 %v272_v58  ;;  %235 = vadd.xlane.f32.xlu1 %v234_v59  ;;  %v420_v1 = vsel %vm418_vm10, %v1028_v54, 0.0  ;;  %v496_v2 = vsel %vm494_vm9, %v1028_v54, 0.0  ;;  %v267_v6 = vsel %vm265_vm12, %v1030_v55, 0.0  ;;  %v229_v7 = vsel %vm227_vm11, %v1030_v55, 0.0 }
 0x235   :  { %v424_v4 = vsel %vm57_vm1, %v420_v1, 0.0  ;;  %v500_v5 = vsel %vm57_vm1, %v496_v2, 0.0  ;;  %v269_v8 = vsel %vm57_vm1, %v267_v6, 0.0  ;;  %v231_v9 = vsel %vm57_vm1, %v229_v7, 0.0 }
 0x236   :  { %v381_v11 = vsel %vm379_vm13, %v1030_v55, 0.0  ;;  %v419_v12 = vsel %vm417_vm14, %v1030_v55, 0.0  ;;  %v534_v15 = vsel %vm532_vm2, %v1028_v54, 0.0  ;;  %v457_v16 = vsel %vm455_vm15, %v1030_v55, 0.0 }
 0x237   :  { %v383_v13 = vsel %vm57_vm1, %v381_v11, 0.0  ;;  %v421_v14 = vsel %vm57_vm1, %v419_v12, 0.0  ;;  %v538_v19 = vsel %vm57_vm1, %v534_v15, 0.0  ;;  %v459_v20 = vsel %vm57_vm1, %v457_v16, 0.0 }
 0x238   :  { %387 = vadd.xlane.f32.xlu0 %v386_v63  ;;  %463 = vadd.xlane.f32.xlu1 %v462_v0  ;;  %v572_v21 = vsel %vm570_vm4, %v1028_v54, 0.0  ;;  %v495_v24 = vsel %vm493_vm3, %v1030_v55, 0.0  ;;  %vm531_vm5 = vcmp.eq.s32.totalorder %v527_v3, %v1010_v23  ;;  %vm304_vm6 = vcmp.eq.s32.totalorder %v302_v18, %v1010_v23 }
 0x239   :  { %v576_v25 = vsel %vm57_vm1, %v572_v21, 0.0  ;;  %v497_v26 = vsel %vm57_vm1, %v495_v24, 0.0  ;;  %v306_v28 = vsel %vm304_vm6, %v1028_v54, 0.0  ;;  %v533_v29 = vsel %vm531_vm5, %v1030_v55, 0.0 }
 0x23a   :  { %vm569_vm7 = vcmp.eq.s32.totalorder %v565_v17, %v1010_v23  ;;  %vm342_vm8 = vcmp.eq.s32.totalorder %v340_v27, %v1010_v23  ;;  %v310_v30 = vsel %vm57_vm1, %v306_v28, 0.0  ;;  %v535_v31 = vsel %vm57_vm1, %v533_v29, 0.0 }
 0x23b   :  { %v344_v32 = vsel %vm342_vm8, %v1028_v54, 0.0  ;;  %v571_v33 = vsel %vm569_vm7, %v1030_v55, 0.0  ;;  %vm303_vm9 = vcmp.eq.s32.totalorder %v1022_v44, %v1010_v23  ;;  %vm341_vm10 = vcmp.eq.s32.totalorder %v337_v34, %v1010_v23 }
 0x23c   :  { %425 = vadd.xlane.f32.xlu0 %v424_v4  ;;  %501 = vadd.xlane.f32.xlu1 %v500_v5  ;;  %v348_v35 = vsel %vm57_vm1, %v344_v32, 0.0  ;;  %v573_v36 = vsel %vm57_vm1, %v571_v33, 0.0  ;;  %v305_v37 = vsel %vm303_vm9, %v1030_v55, 0.0  ;;  %v343_v39 = vsel %vm341_vm10, %v1030_v55, 0.0 }
 0x23d   :  { %v307_v38 = vsel %vm57_vm1, %v305_v37, 0.0  ;;  %v345_v40 = vsel %vm57_vm1, %v343_v39, 0.0 }
 0x240   :  { %270 = vadd.xlane.f32.xlu1 %v269_v8  ;;  %232 = vadd.xlane.f32.xlu0 %v231_v9 }
 0x244   :  { %384 = vadd.xlane.f32.xlu1 %v383_v13  ;;  %422 = vadd.xlane.f32.xlu0 %v421_v14 }
 0x248   :  { %539 = vadd.xlane.f32.xlu1 %v538_v19  ;;  %460 = vadd.xlane.f32.xlu0 %v459_v20 }
 0x24c   :  { %577 = vadd.xlane.f32.xlu1 %v576_v25  ;;  %498 = vadd.xlane.f32.xlu0 %v497_v26 }
 0x250   :  { %311 = vadd.xlane.f32.xlu1 %v310_v30  ;;  %536 = vadd.xlane.f32.xlu0 %v535_v31 }
 0x254   :  { %349 = vadd.xlane.f32.xlu1 %v348_v35  ;;  %574 = vadd.xlane.f32.xlu0 %v573_v36 }
 0x258   :  { %308 = vadd.xlane.f32.xlu0 %v307_v38 }
 0x25c   :  { %346 = vadd.xlane.f32.xlu0 %v345_v40 }
 0x2c1   :  { %v1089_v41 = vpop.xlane.xlu0 %273  ;;  %v1091_v42 = vpop.xlane.xlu1 %235 }
 0x2c2   :  { %v276_v43 = vsub.f32 0.0, %v1089_v41  ;;  %v238_v44 = vsub.f32 0.0, %v1091_v42 }
 0x2c4   :  { %v280_v23 = vand.u32 2147483647, %v276_v43  ;;  %v242_v49 = vand.u32 2147483647, %v238_v44 }
 0x2c5   :  { %v388_v45 = vpop.xlane.xlu0 %387  ;;  %v464_v46 = vpop.xlane.xlu1 %463 }
 0x2c6   :  { %v390_v47 = vsub.f32 0.0, %v388_v45  ;;  %v466_v48 = vsub.f32 0.0, %v464_v46  ;;  %v282_v54 = vsub.f32 0.0, %v280_v23  ;;  %v244_v57 = vsub.f32 0.0, %v242_v49 }
 0x2c8   :  { %v686_v50 = vmul.f32 -1.442695, %v390_v47  ;;  %v690_v51 = vmul.f32 -1.442695, %v466_v48  ;;  %v285_v62 = vmul.f32 1.442695, %v282_v54 }
 0x2c9   :  { %v426_v52 = vpop.xlane.xlu0 %425  ;;  %v502_v53 = vpop.xlane.xlu1 %501  ;;  %v247_v0 = vmul.f32 1.442695, %v244_v57 }
 0x2ca   :  { %v428_v55 = vsub.f32 0.0, %v426_v52  ;;  %v504_v56 = vsub.f32 0.0, %v502_v53  ;;  %798 = vpow2.f32 %v686_v50 }
 0x2cb   :  { %800 = vpow2.f32 %v690_v51 }
 0x2cc   :  { %v688_v58 = vmul.f32 -1.442695, %v428_v55  ;;  %v692_v59 = vmul.f32 -1.442695, %v504_v56 }
 0x2cd   :  { %v1099_v60 = vpop.xlane.xlu1 %270  ;;  %v1101_v61 = vpop.xlane.xlu0 %232 }
 0x2ce   :  { %802 = vpow2.f32 %v688_v58  ;;  %v275_v63 = vsub.f32 0.0, %v1099_v60  ;;  %v237_v11 = vsub.f32 0.0, %v1101_v61 }
 0x2cf   :  { %804 = vpow2.f32 %v692_v59 }
 0x2d0   :  { %v279_v1 = vand.u32 2147483647, %v275_v63  ;;  %806 = vpow2.f32 %v285_v62  ;;  %v241_v27 = vand.u32 2147483647, %v237_v11 }
 0x2d1   :  { %v385_v2 = vpop.xlane.xlu1 %384  ;;  %v423_v3 = vpop.xlane.xlu0 %422  ;;  %808 = vpow2.f32 %v247_v0 }
 0x2d2   :  { %v281_v4 = vsub.f32 0.0, %v279_v1  ;;  %v389_v8 = vsub.f32 0.0, %v385_v2  ;;  %v427_v12 = vsub.f32 0.0, %v423_v3  ;;  %v243_v39 = vsub.f32 0.0, %v241_v27 }
 0x2d4   :  { %v799_v7 = vpop.eup %798  ;;  %v283_v18 = vmul.f32 1.442695, %v281_v4  ;;  %v685_v25 = vmul.f32 -1.442695, %v389_v8  ;;  %v687_v28 = vmul.f32 -1.442695, %v427_v12 }
 0x2d5   :  { %v540_v5 = vpop.xlane.xlu1 %539  ;;  %v461_v6 = vpop.xlane.xlu0 %460  ;;  %v398_v10 = vadd.f32 1.0, %v799_v7  ;;  %v245_v50 = vmul.f32 1.442695, %v243_v39 }
 0x2d6   :  { %v801_v9 = vpop.eup %800  ;;  %v542_v15 = vsub.f32 0.0, %v540_v5  ;;  %v465_v19 = vsub.f32 0.0, %v461_v6 }
 0x2d7   :  { %v474_v14 = vadd.f32 1.0, %v801_v9  ;;  %810 = vrcp.f32 %v398_v10 }
 0x2d8   :  { %v803_v13 = vpop.eup %802  ;;  %v694_v30 = vmul.f32 -1.442695, %v542_v15  ;;  %v689_v32 = vmul.f32 -1.442695, %v465_v19 }
 0x2d9   :  { %v805_v16 = vpop.eup %804  ;;  %v436_v17 = vadd.f32 1.0, %v803_v13  ;;  %v578_v20 = vpop.xlane.xlu1 %577  ;;  %812 = vrcp.f32 %v474_v14 }
 0x2da   :  { %v499_v21 = vpop.xlane.xlu0 %498  ;;  %v512_v24 = vadd.f32 1.0, %v805_v16  ;;  %v580_v26 = vsub.f32 0.0, %v578_v20  ;;  %v807_v29 = vpop.eup %806 }
 0x2db   :  { %814 = vrcp.f32 %v436_v17  ;;  %v503_v31 = vsub.f32 0.0, %v499_v21  ;;  %v809_v35 = vpop.eup %808  ;;  %v288_v38 = vadd.f32 1.0, %v807_v29 }
 0x2dc   :  { %816 = vrcp.f32 %v512_v24  ;;  %v696_v36 = vmul.f32 -1.442695, %v580_v26  ;;  %v250_v46 = vadd.f32 1.0, %v809_v35 }
 0x2dd   :  { %818 = vpow2.f32 %v283_v18  ;;  %v1109_v33 = vpop.xlane.xlu1 %311  ;;  %v691_v40 = vmul.f32 -1.442695, %v503_v31 }
 0x2de   :  { %v537_v34 = vpop.xlane.xlu0 %536  ;;  %820 = vpow2.f32 %v685_v25  ;;  %v314_v45 = vsub.f32 0.0, %v1109_v33 }
 0x2df   :  { %v541_v37 = vsub.f32 0.0, %v537_v34  ;;  %822 = vpow2.f32 %v687_v28 }
 0x2e0   :  { %824 = vpow2.f32 %v694_v30  ;;  %v318_v54 = vand.u32 2147483647, %v314_v45  ;;  %v316_v41 = vmax.f32 %v314_v45, 0.0 }
 0x2e1   :  { %826 = vpow2.f32 %v689_v32  ;;  %v1112_v23 = vpop.xlane.xlu1 %349  ;;  %v693_v48 = vmul.f32 -1.442695, %v541_v37  ;;  %v811_v49 = vpop.eup %810 }
 0x2e2   :  { %v575_v47 = vpop.xlane.xlu0 %574  ;;  %828 = vpow2.f32 %v696_v36  ;;  %v352_v51 = vsub.f32 0.0, %v1112_v23  ;;  %v404_v53 = vadd.f32 0.001, %v811_v49  ;;  %v320_v4 = vsub.f32 0.0, %v318_v54 }
 0x2e3   :  { %830 = vlog2.f32 %v288_v38  ;;  %v813_v52 = vpop.eup %812  ;;  %v579_v18 = vsub.f32 0.0, %v575_v47 }
 0x2e4   :  { %832 = vpow2.f32 %v691_v40  ;;  %v480_v56 = vadd.f32 0.001, %v813_v52  ;;  %v356_v0 = vand.u32 2147483647, %v352_v51  ;;  %v323_v17 = vmul.f32 1.442695, %v320_v4 }
 0x2e5   :  { %v815_v55 = vpop.eup %814  ;;  %834 = vlog2.f32 %v250_v46  ;;  %v695_v32 = vmul.f32 -1.442695, %v579_v18  ;;  %v354_v33 = vmax.f32 %v352_v51, 0.0 }
 0x2e6   :  { %v1117_v57 = vpop.xlane.xlu0 %308  ;;  %v817_v58 = vpop.eup %816  ;;  %v442_v59 = vadd.f32 0.001, %v815_v55  ;;  %836 = vpow2.f32 %v693_v48  ;;  %v358_v15 = vsub.f32 0.0, %v356_v0 }
 0x2e7   :  { %v819_v62 = vpop.eup %818  ;;  %838 = vpow2.f32 %v245_v50  ;;  %v313_v1 = vsub.f32 0.0, %v1117_v57  ;;  %v518_v3 = vadd.f32 0.001, %v817_v58 }
 0x2e8   :  { %v821_v2 = vpop.eup %820  ;;  %840 = vlog2.f32 %v404_v53  ;;  %v361_v30 = vmul.f32 1.442695, %v358_v15  ;;  %v287_v46 = vadd.f32 1.0, %v819_v62  ;;  %v603_v15 = vshrl.u32 %v43_v22, 7 }
 0x2e9   :  { %v823_v5 = vpop.eup %822  ;;  %842 = vlog2.f32 %v480_v56  ;;  %v397_v6 = vadd.f32 1.0, %v821_v2  ;;  %v317_v7 = vand.u32 2147483647, %v313_v1  ;;  %v315_v61 = vmax.f32 %v313_v1, 0.0 }
 0x2ea   :  { %v1124_v8 = vpop.xlane.xlu0 %346  ;;  %v825_v9 = vpop.eup %824  ;;  %844 = vlog2.f32 %v442_v59  ;;  %v435_v10 = vadd.f32 1.0, %v823_v5 }
 0x2eb   :  { %v351_v12 = vsub.f32 0.0, %v1124_v8  ;;  %v827_v13 = vpop.eup %826  ;;  %846 = vrcp.f32 %v397_v6  ;;  %v550_v14 = vadd.f32 1.0, %v825_v9  ;;  %v319_v25 = vsub.f32 0.0, %v317_v7 }
 0x2ec   :  { %v829_v16 = vpop.eup %828  ;;  %848 = vlog2.f32 %v518_v3  ;;  %v473_v21 = vadd.f32 1.0, %v827_v13 }
 0x2ed   :  { %v355_v19 = vand.u32 2147483647, %v351_v12  ;;  %v1129_v20 = vpop.eup %830  ;;  %850 = vrcp.f32 %v550_v14  ;;  %v588_v24 = vadd.f32 1.0, %v829_v16  ;;  %v321_v35 = vmul.f32 1.442695, %v319_v25 }
 0x2ee   :  { %v833_v26 = vpop.eup %832  ;;  %852 = vrcp.f32 %v435_v10  ;;  %v353_v23 = vmax.f32 %v351_v12, 0.0 }
 0x2ef   :  { %v357_v27 = vsub.f32 0.0, %v355_v19  ;;  %v1131_v28 = vpop.eup %834  ;;  %854 = vrcp.f32 %v588_v24  ;;  %v511_v29 = vadd.f32 1.0, %v833_v26 }
 0x2f0   :  { %v837_v31 = vpop.eup %836  ;;  %856 = vpow2.f32 %v323_v17 }
 0x2f1   :  { %v839_v34 = vpop.eup %838  ;;  %858 = vrcp.f32 %v473_v21  ;;  %v359_v37 = vmul.f32 1.442695, %v357_v27  ;;  %v549_v39 = vadd.f32 1.0, %v837_v31  ;;  %v292_v27 = vmul.f32 0.6931472, %v1129_v20 }
 0x2f2   :  { %v841_v36 = vpop.eup %840  ;;  %860 = vrcp.f32 %v511_v29  ;;  %v249_v48 = vadd.f32 1.0, %v839_v34  ;;  %v254_v29 = vmul.f32 0.6931472, %v1131_v28  ;;  %v604_v34 = vadd.s32 8, %v603_v15 }
 0x2f3   :  { %v843_v38 = vpop.eup %842  ;;  %862 = vpow2.f32 %v361_v30  ;;  %v408_v52 = vmul.f32 0.6931472, %v841_v36  ;;  %v240_v36 = vmax.f32 %v238_v44, 0.0  ;;  %v277_v44 = vmax.f32 %v275_v63, 0.0 }
 0x2f4   :  { %v845_v40 = vpop.eup %844  ;;  %864 = vpow2.f32 %v695_v32  ;;  %v484_v14 = vmul.f32 0.6931472, %v843_v38  ;;  %vm609_vm1 = vcmp.lt.s32.totalorder %v604_v34, 10 }
 0x2f5   :  { %v847_v47 = vpop.eup %846  ;;  %866 = vpow2.f32 %v321_v35  ;;  %v446_v58 = vmul.f32 0.6931472, %v845_v40  ;;  %v410_v2 = vsub.f32 0.0, %v408_v52  ;;  %v278_v35 = vmax.f32 %v276_v43, 0.0 }
 0x2f6   :  { %v849_v49 = vpop.eup %848  ;;  %868 = vpow2.f32 %v359_v37  ;;  %v403_v53 = vadd.f32 0.001, %v847_v47 }
 0x2f7   :  { %v851_v50 = vpop.eup %850  ;;  %870 = vrcp.f32 %v549_v39  ;;  %v448_v7 = vsub.f32 %v410_v2, %v446_v58  ;;  %v522_v32 = vmul.f32 0.6931472, %v849_v49  ;;  %v294_v28 = vadd.f32 %v292_v27, %v278_v35 }
 0x2f8   :  { %v853_v54 = vpop.eup %852  ;;  %872 = vlog2.f32 %v287_v46  ;;  %v556_v55 = vadd.f32 0.001, %v851_v50  ;;  %v256_v46 = vadd.f32 %v254_v29, %v240_v36  ;;  %v610_v29 = vld [vmem:[#allocation2] sm:$0xff] }
 0x2f9   :  { %v855_v56 = vpop.eup %854  ;;  %874 = vlog2.f32 %v249_v48  ;;  %v441_v3 = vadd.f32 0.001, %v853_v54  ;;  %v486_v24 = vsub.f32 %v448_v7, %v484_v14 }
 0x2fa   :  { %v857_v59 = vpop.eup %856  ;;  %876 = vlog2.f32 %v556_v55  ;;  %v594_v0 = vadd.f32 0.001, %v855_v56  ;;  %v620_v56 = vld [vmem:[#allocation3 + $0x8] sm:$0xff] }
 0x2fb   :  { %v859_v62 = vpop.eup %858  ;;  %878 = vlog2.f32 %v403_v53  ;;  %v326_v4 = vadd.f32 1.0, %v857_v59  ;;  %v524_v39 = vsub.f32 %v486_v24, %v522_v32  ;;  %v239_v53 = vmax.f32 %v237_v11, 0.0 }
 0x2fc   :  { %v861_v5 = vpop.eup %860  ;;  %880 = vlog2.f32 %v594_v0  ;;  %v479_v18 = vadd.f32 0.001, %v859_v62  ;;  %v296_v59 = vadd.f32 %v294_v28, %v256_v46 }
 0x2fd   :  { %v863_v6 = vpop.eup %862  ;;  %882 = vlog2.f32 %v326_v4  ;;  %v517_v30 = vadd.f32 0.001, %v861_v5 }
 0x2fe   :  { %v865_v9 = vpop.eup %864  ;;  %v364_v10 = vadd.f32 1.0, %v863_v6  ;;  %884 = vlog2.f32 %v441_v3 }
 0x2ff   :  { %v867_v13 = vpop.eup %866  ;;  %v587_v16 = vadd.f32 1.0, %v865_v9 }
 0x300   :  { %v869_v17 = vpop.eup %868  ;;  %886 = vlog2.f32 %v364_v10  ;;  %v325_v19 = vadd.f32 1.0, %v867_v13 }
 0x301   :  { %v871_v21 = vpop.eup %870  ;;  %888 = vrcp.f32 %v587_v16  ;;  %v363_v25 = vadd.f32 1.0, %v869_v17  ;;  %v611_v17 = vld [vmem:[#allocation2 + $0x8] sm:$0xff] }
 0x302   :  { %v873_v26 = vpop.eup %872  ;;  %890 = vlog2.f32 %v325_v19  ;;  %v555_v37 = vadd.f32 0.001, %v871_v21 }
 0x303   :  { %v875_v31 = vpop.eup %874  ;;  %892 = vlog2.f32 %v363_v25  ;;  %v290_v48 = vmul.f32 0.6931472, %v873_v26 }
 0x304   :  { %v877_v22 = vpop.eup %876  ;;  %894 = vlog2.f32 %v479_v18  ;;  %v252_v49 = vmul.f32 0.6931472, %v875_v31 }
 0x305   :  { %v879_v38 = vpop.eup %878  ;;  %v560_v20 = vmul.f32 0.6931472, %v877_v22  ;;  %896 = vlog2.f32 %v517_v30  ;;  %v293_v62 = vadd.f32 %v290_v48, %v277_v44 }
 0x306   :  { %v881_v40 = vpop.eup %880  ;;  %898 = vlog2.f32 %v555_v37  ;;  %v406_v54 = vmul.f32 0.6931472, %v879_v38  ;;  %v255_v2 = vadd.f32 %v252_v49, %v239_v53  ;;  %v619_v38 = vld [vmem:[#allocation3] sm:$0xff] }
 0x307   :  { %v883_v47 = vpop.eup %882  ;;  %v562_v50 = vsub.f32 %v524_v39, %v560_v20  ;;  %v598_v52 = vmul.f32 0.6931472, %v881_v40 }
 0x308   :  { %v330_v43 = vmul.f32 0.6931472, %v883_v47  ;;  %v885_v42 = vpop.eup %884  ;;  %v409_v6 = vsub.f32 0.0, %v406_v54  ;;  %v295_v14 = vadd.f32 %v293_v62, %v255_v2 }
 0x309   :  { %v600_v55 = vsub.f32 %v562_v50, %v598_v52  ;;  %v444_v15 = vmul.f32 0.6931472, %v885_v42 }
 0x30a   :  { %v887_v58 = vpop.eup %886  ;;  %v332_v0 = vadd.f32 %v330_v43, %v316_v41 }
 0x30b   :  { %v889_v45 = vpop.eup %888  ;;  %v622_v3 = vsel %vm609_vm1, %v600_v55, 0.0  ;;  %v368_v4 = vmul.f32 0.6931472, %v887_v58  ;;  %v447_v19 = vsub.f32 %v409_v6, %v444_v15 }
 0x30c   :  { %v891_v60 = vpop.eup %890  ;;  %v624_v63 = vadd.f32 %v622_v3, %v620_v56  ;;  %v593_v5 = vadd.f32 0.001, %v889_v45  ;;  %v334_v7 = vadd.f32 %v332_v0, %v296_v59 }
 0x30d   :  { %v893_v11 = vpop.eup %892  ;;  %v370_v9 = vadd.f32 %v368_v4, %v354_v33  ;;  %v328_v10 = vmul.f32 0.6931472, %v891_v60 }
 0x30e   :  { %v895_v13 = vpop.eup %894  ;;  %626 = vst.msk [vmem:[#allocation3 + $0x8] sm:$0xff] %vm22_vm0, %v624_v63  ;;  %900 = vlog2.f32 %v593_v5  ;;  %v366_v51 = vmul.f32 0.6931472, %v893_v11 }
 0x30f   :  { %v372_v16 = vadd.f32 %v370_v9, %v334_v7  ;;  %v331_v18 = vadd.f32 %v328_v10, %v315_v61  ;;  %v897_v57 = vpop.eup %896  ;;  %v482_v21 = vmul.f32 0.6931472, %v895_v13 }
 0x310   :  { %v369_v1 = vadd.f32 %v366_v51, %v353_v23  ;;  %v899_v26 = vpop.eup %898  ;;  %v520_v30 = vmul.f32 0.6931472, %v897_v57 }
 0x311   :  { %v613_v24 = vsel %vm609_vm1, %v372_v16, 0.0  ;;  %v333_v25 = vadd.f32 %v331_v18, %v295_v14  ;;  %v485_v8 = vsub.f32 %v447_v19, %v482_v21  ;;  %v558_v12 = vmul.f32 0.6931472, %v899_v26 }
 0x312   :  { %v615_v27 = vadd.f32 %v613_v24, %v611_v17 }
 0x313   :  { %v371_v31 = vadd.f32 %v369_v1, %v333_v25  ;;  %v523_v22 = vsub.f32 %v485_v8, %v520_v30 }
 0x314   :  { %618 = vst.msk [vmem:[#allocation2 + $0x8] sm:$0xff] %vm22_vm0, %v615_v27 }
 0x315   :  { %v614_v32 = vadd.f32 %v610_v29, %v371_v31  ;;  %v561_v36 = vsub.f32 %v523_v22, %v558_v12  ;;  %v647_v48 = vld [vmem:[#allocation3 + $0x8] sm:$0xff] }
 0x316   :  { %v649_v52 = vsel %vm22_vm0, %v647_v48, 0.0 }
 0x317   :  { %617 = vst.msk [vmem:[#allocation2] sm:$0xff] %vm22_vm0, %v614_v32 }
 0x318   :  { %v901_v35 = vpop.eup %900 }
 0x319   :  { %v596_v37 = vmul.f32 0.6931472, %v901_v35 }
 0x31b   :  { %v599_v34 = vsub.f32 %v561_v36, %v596_v37  ;;  %v631_v39 = vld [vmem:[#allocation2 + $0x8] sm:$0xff] }
 0x31c   :  { %v633_v46 = vsel %vm22_vm0, %v631_v39, 0.0 }
 0x31d   :  { %v623_v20 = vadd.f32 %v619_v38, %v599_v34 }
 0x31e   :  { %v630_v40 = vld [vmem:[#allocation2] sm:$0xff] }
 0x31f   :  { %625 = vst.msk [vmem:[#allocation3] sm:$0xff] %vm22_vm0, %v623_v20  ;;  %v632_v28 = vsel %vm22_vm0, %v630_v40, 0.0 }
 0x320   :  { %v634_v47 = vadd.f32 %v633_v46, %v632_v28 }
 0x322   :  { %635 = vadd.xlane.f32.xlu1 %v634_v47 }
 0x326   :  { %v646_v49 = vld [vmem:[#allocation3] sm:$0xff] }
 0x327   :  { %v648_v50 = vsel %vm22_vm0, %v646_v49, 0.0  ;;  %vm663_vm0 = vcmask 0  }
 0x328   :  { %v650_v41 = vadd.f32 %v649_v52, %v648_v50 }
 0x32a   :  { %651 = vadd.xlane.f32.xlu0 %v650_v41 }
 0x3af   :  { %v636_v43 = vpop.xlane.xlu1 %635 }
 0x3b0   :  { %v637_v42 = vrot.slane %v636_v43, 4 }
 0x3b2   :  { %v638_v44 = vadd.f32 %v637_v42, %v636_v43 }
 0x3b4   :  { %v639_v53 = vrot.slane %v638_v44, 2 }
 0x3b6   :  { %v640_v54 = vadd.f32 %v639_v53, %v638_v44 }
 0x3b7   :  { %v652_v55 = vpop.xlane.xlu0 %651 }
 0x3b8   :  { %v653_v56 = vrot.slane %v652_v55, 4  ;;  %v641_v58 = vrot.slane %v640_v54, 1 }
 0x3ba   :  { %v654_v59 = vadd.f32 %v653_v56, %v652_v55  ;;  %v642_v0 = vadd.f32 %v641_v58, %v640_v54 }
 0x3bc   :  { %v655_v33 = vrot.slane %v654_v59, 2  ;;  %767 = vpush %v642_v0 }
 0x3be   :  { %v656_v45 = vadd.f32 %v655_v33, %v654_v59 }
 0x3c0   :  { %v657_v62 = vrot.slane %v656_v45, 1 }
 0x3c2   :  { %v658_v2 = vadd.f32 %v657_v62, %v656_v45 }
 0x3c4   :  { %769 = vpush %v658_v2 }
 0x3ed   :  { %s768_s0 = spop %767 }
 0x3ee   :  { %v644_v3 = vstv %s768_s0 }
 0x3ef   :  { %v645_v4 = vmul.f32 0.025, %v644_v3 }
 0x3f5   :  { %s770_s18 = spop %769 }
 0x3f6   :  { %v660_v60 = vstv %s770_s18 }
 0x3f7   :  { %v661_v63 = vmul.f32 0.016666668, %v660_v60 }
 0x3f9   :  { %v662_v5 = vadd.f32 %v661_v63, %v645_v4 }
 0x3fb   :  { %664 = vst.msk [vmem:[#allocation4] sm:$0x1] %vm663_vm0, %v662_v5 }
 0x3fc   :  { %913 = shalt.err (!%p910_p4)
}
 0x3fd   :  { %s914_s25 = scalar_lea.hbm %s1178_s4, 16 }
 0x3fe   :  { %p915_p5 = scmp.ne.s32.totalorder %s1178_s4, %s914_s25  ;;  %p918_p6 = scmp.lt.u32.totalorder %s914_s25, %s1178_s4 }
 0x400   :  { %p920_p7 = pnand %p918_p6, %p915_p5 }
 0x402   :  { %923 = shalt.err (!%p920_p7)
}
 0x403   :  { %674 = dma.vmem_to_hbm [thread:$0]  %s672_s20, 16, %s1178_s4, [#allocation5]  }
 0x404   :  { %924 = dma.done.wait [#allocation5], 16  }
 0x405   :  { %925 = vsyncadd [#allocation5], 4294967280 }
 0x406   :  { %678 = vsyncpa [#allocation5], 1 }

</bundles_post_ra>
